<compile_context>
chip_gen: v6e
topology: v6e:2x2x1
jax: 0.10.0
libtpu: 0.0.40
codegen_flags: <defaults>
</compile_context>

<pallas_src>
import functools
import math

import jax
import jax.numpy as jnp
from jax.experimental import pallas as pl
from jax.experimental.pallas import tpu as pltpu

_LANE = 128  # TPU lane width; hidden feature dims are padded to multiples of this.


def _round_up(n, m):
    return ((n + m - 1) // m) * m


def _apply_act(y, act_fn):
    if act_fn == "relu":
        return jnp.maximum(y, 0.0)
    if act_fn == "tanh":
        return jnp.tanh(y)
    if act_fn == "sigmoid":
        return jax.nn.sigmoid(y)
    if act_fn == "elu":
        return jax.nn.elu(y)
    if act_fn == "leaky_relu":
        return jax.nn.leaky_relu(y)
    raise ValueError(f"unsupported activation: {act_fn}")


def _fused_mlp_kernel(*refs, depth, act_fn, matmul_dtype):
    """Whole-MLP forward on VMEM-resident tiles.

    refs = (x_ref, w0_ref, b0_ref, ..., w{d-1}_ref, b{d-1}_ref, o_ref)
    Weights arrive already cast to `matmul_dtype` (bf16); activations are cast
    per-layer right before the MXU dot, accumulation stays f32.
    """
    x_ref = refs[0]
    o_ref = refs[-1]
    p_refs = refs[1:-1]

    x = x_ref[...].astype(jnp.float32)
    for i in range(depth):
        w = p_refs[2 * i][...]                       # (d_in_pad, d_out[_pad]) bf16
        b = p_refs[2 * i + 1][...]                   # (1, d_out[_pad]) f32, broadcasts
        y = jnp.dot(x.astype(matmul_dtype), w,
                    preferred_element_type=jnp.float32) + b
        if i < depth - 1:
            x = _apply_act(y, act_fn)                # hidden activation (VPU/EUP)
        else:
            x = jax.nn.sigmoid(y)                    # final layer: sigmoid (EUP)
    o_ref[...] = x.astype(o_ref.dtype)


def init_mlp_params(key, units_list):
    """Deterministic init matching MLP.init_parameters():
    each param ~ U(-stdv, stdv) with stdv = 1/sqrt(param.size(-1))."""
    params = []
    depth = len(units_list) - 1
    for i in range(depth):
        d_in, d_out = units_list[i], units_list[i + 1]
        key, kw, kb = jax.random.split(key, 3)
        # PyTorch weight shape is (out, in) -> size(-1) = in
        w_stdv = 1.0 / math.sqrt(d_in)
        w_torch_layout = jax.random.uniform(
            kw, (d_out, d_in), jnp.float32, -w_stdv, w_stdv
        )
        w = w_torch_layout.T  # store as (in, out) for x @ W
        # bias shape (out,) -> size(-1) = out
        b_stdv = 1.0 / math.sqrt(d_out)
        b = jax.random.uniform(kb, (1, d_out), jnp.float32, -b_stdv, b_stdv)
        params.append((w, b))
    return params


def _pad2(a, rows, cols):
    r, c = a.shape
    if r == rows and c == cols:
        return a
    return jnp.zeros((rows, cols), a.dtype).at[:r, :c].set(a)


def pad_params(params, lane=_LANE, matmul_dtype=jnp.bfloat16):
    """Zero-pad HIDDEN output dims (and chained input dims) to lane width and cast
    weights to the matmul dtype.  The LAST layer's output dim is left unpadded so
    the kernel can write the real (B, d_out) array (lane-minimal writeback).
    Biases stay float32."""
    padded = []
    depth = len(params)
    prev_out_pad = None
    for i, (w, b) in enumerate(params):
        d_in, d_out = w.shape
        d_in_pad = d_in if i == 0 else prev_out_pad
        d_out_pad = d_out if i == depth - 1 else _round_up(d_out, lane)
        padded.append((_pad2(w, d_in_pad, d_out_pad).astype(matmul_dtype),
                       _pad2(b, 1, d_out_pad)))
        prev_out_pad = d_out_pad
    return padded


def mlp_forward(x, padded_params, act_fn="relu", *, batch_tile=1024,
                single_block_max_batch=4096, min_grid_steps=16):
    """Fused MLP forward. x: (B, d_in). Returns (B, d_out)."""
    depth = len(padded_params)
    flat = []
    for w, b in padded_params:
        flat.extend((w, b))
    batch, d_in = x.shape
    d_out = padded_params[-1][0].shape[1]
    matmul_dtype = padded_params[0][0].dtype
    kernel = functools.partial(_fused_mlp_kernel, depth=depth, act_fn=act_fn,
                               matmul_dtype=matmul_dtype)
    n_inputs = 1 + 2 * depth
    out_shape = jax.ShapeDtypeStruct((batch, d_out), x.dtype)

    if batch <= single_block_max_batch:
        # Small / medium batch: everything is a single full-extent VMEM block,
        # no grid, no pipelining machinery (one DMA in, one DMA out).
        vmem = pltpu.MemorySpace.VMEM
        return pl.pallas_call(
            kernel,
            out_shape=out_shape,
            in_specs=[pl.BlockSpec(memory_space=vmem) for _ in range(n_inputs)],
            out_specs=pl.BlockSpec(memory_space=vmem),
        )(x, *flat)

    # Large batch: always tile.  Tile size is adapted so the grid has at least
    # ~min_grid_steps steps (>= ~8 per TensorCore on v7x megacore, enough to hide
    # prologue/epilogue DMAs) while staying as large as possible (per-step
    # overhead ~0.35 us; large tiles approach the HBM roofline).
    tb = min(batch_tile, _round_up(pl.cdiv(batch, min_grid_steps), 8))
    tb = max(tb, 8)
    grid = (pl.cdiv(batch, tb),)  # non-divisible batch -> partial last block (Pallas pads)

    in_specs = [pl.BlockSpec((tb, d_in), lambda i: (i, 0))]
    for w, b in padded_params:
        # Constant index_map -> weights/biases DMA'd once and stay VMEM-resident.
        # (pipeline_mode=pl.Buffered(1) would also drop the dead second buffer,
        #  ~tens of KiB; omitted for lowering robustness — negligible here.)
        in_specs.append(pl.BlockSpec(w.shape, lambda i: (0, 0)))
        in_specs.append(pl.BlockSpec(b.shape, lambda i: (0, 0)))

    return pl.pallas_call(
        kernel,
        out_shape=out_shape,
        grid=grid,
        in_specs=in_specs,
        out_specs=pl.BlockSpec((tb, d_out), lambda i: (i, 0)),
        compiler_params=pltpu.CompilerParams(
            dimension_semantics=("parallel",)),
    )(x, *flat)


def mlp_reference(x, params, act_fn="relu"):
    depth = len(params)
    for i, (w, b) in enumerate(params):
        x = x @ w + b
        x = _apply_act(x, act_fn) if i < depth - 1 else jax.nn.sigmoid(x)
    return x


if __name__ == "__main__":
    key = jax.random.PRNGKey(0)
    units_list = [32, 64, 48, 16]  # 3-layer MLP: 32 -> 64 -> 48 -> 16
    act_fn = "relu"

    key, kp = jax.random.split(key)
    params = init_mlp_params(kp, units_list)   # unpadded f32 (reference)
    padded_params = pad_params(params)         # lane-padded hiddens, bf16 weights (kernel)

    # --- small batch: single fused VMEM-resident kernel, no grid ---
    batch = 8
    key, kx = jax.random.split(key)
    x = jax.random.normal(kx, (batch, units_list[0]), jnp.float32)

    out = jax.block_until_ready(mlp_forward(x, padded_params, act_fn))
    ref = mlp_reference(x, params, act_fn)
    assert out.shape == (batch, units_list[-1])
    # bf16 matmul inputs with f32 accumulation -> loosened tolerance vs f32 reference.
    assert jnp.allclose(out, ref, atol=1e-2, rtol=1e-2), "mismatch (single-block path)"

    # --- larger, NON-divisible batch: tiled path with partial last block ---
    big_batch = 5000
    key, kx2 = jax.random.split(key)
    x_big = jax.random.normal(kx2, (big_batch, units_list[0]), jnp.float32)

    out_big = jax.block_until_ready(mlp_forward(x_big, padded_params, act_fn))
    ref_big = mlp_reference(x_big, params, act_fn)
    assert out_big.shape == (big_batch, units_list[-1])
    assert jnp.allclose(out_big, ref_big, atol=1e-2, rtol=1e-2), "mismatch (tiled path)"

    print("KERNEL_OK")
</pallas_src>

<mosaic_0001>
module attributes {stable_mosaic.version = 11 : i64} {
  func.func @_fused_mlp_kernel(%arg0: memref<8x32xf32, #tpu.memory_space<vmem>>, %arg1: memref<32x128xbf16, #tpu.memory_space<vmem>>, %arg2: memref<1x128xf32, #tpu.memory_space<vmem>>, %arg3: memref<128x128xbf16, #tpu.memory_space<vmem>>, %arg4: memref<1x128xf32, #tpu.memory_space<vmem>>, %arg5: memref<128x16xbf16, #tpu.memory_space<vmem>>, %arg6: memref<1x16xf32, #tpu.memory_space<vmem>>, %arg7: memref<8x16xf32, #tpu.memory_space<vmem>>) attributes {dimension_semantics = [], scalar_prefetch = 0 : i64, scratch_operands = 0 : i64, tpu.core_type = #tpu.core_type<tc>} {
    %c0 = arith.constant 0 : index
    %c0_0 = arith.constant 0 : index
    %0 = vector.load %arg0[%c0, %c0_0] : memref<8x32xf32, #tpu.memory_space<vmem>>, vector<8x32xf32>
    %c0_1 = arith.constant 0 : index
    %c0_2 = arith.constant 0 : index
    %1 = vector.load %arg1[%c0_1, %c0_2] : memref<32x128xbf16, #tpu.memory_space<vmem>>, vector<32x128xbf16>
    %c0_3 = arith.constant 0 : index
    %c0_4 = arith.constant 0 : index
    %2 = vector.load %arg2[%c0_3, %c0_4] : memref<1x128xf32, #tpu.memory_space<vmem>>, vector<1x128xf32>
    %3 = arith.truncf %0 : vector<8x32xf32> to vector<8x32xbf16>
    %cst = arith.constant dense<0.000000e+00> : vector<8x128xf32>
    %4 = tpu.matmul %3, %1, %cst {dimension_numbers = #tpu.dot_dimension_numbers<[1], [0], [0], [1], [0, 0, 1, 1], [], []>} : vector<8x32xbf16>, vector<32x128xbf16>, vector<8x128xf32> -> vector<8x128xf32>
    %5 = vector.broadcast %2 : vector<1x128xf32> to vector<8x128xf32>
    %6 = arith.addf %4, %5 : vector<8x128xf32>
    %cst_5 = arith.constant 0.000000e+00 : f32
    %7 = vector.broadcast %cst_5 : f32 to vector<8x128xf32>
    %8 = arith.maximumf %6, %7 : vector<8x128xf32>
    %c0_6 = arith.constant 0 : index
    %c0_7 = arith.constant 0 : index
    %9 = vector.load %arg3[%c0_6, %c0_7] : memref<128x128xbf16, #tpu.memory_space<vmem>>, vector<128x128xbf16>
    %c0_8 = arith.constant 0 : index
    %c0_9 = arith.constant 0 : index
    %10 = vector.load %arg4[%c0_8, %c0_9] : memref<1x128xf32, #tpu.memory_space<vmem>>, vector<1x128xf32>
    %11 = arith.truncf %8 : vector<8x128xf32> to vector<8x128xbf16>
    %cst_10 = arith.constant dense<0.000000e+00> : vector<8x128xf32>
    %12 = tpu.matmul %11, %9, %cst_10 {dimension_numbers = #tpu.dot_dimension_numbers<[1], [0], [0], [1], [0, 0, 1, 1], [], []>} : vector<8x128xbf16>, vector<128x128xbf16>, vector<8x128xf32> -> vector<8x128xf32>
    %13 = vector.broadcast %10 : vector<1x128xf32> to vector<8x128xf32>
    %14 = arith.addf %12, %13 : vector<8x128xf32>
    %cst_11 = arith.constant 0.000000e+00 : f32
    %15 = vector.broadcast %cst_11 : f32 to vector<8x128xf32>
    %16 = arith.maximumf %14, %15 : vector<8x128xf32>
    %c0_12 = arith.constant 0 : index
    %c0_13 = arith.constant 0 : index
    %17 = vector.load %arg5[%c0_12, %c0_13] : memref<128x16xbf16, #tpu.memory_space<vmem>>, vector<128x16xbf16>
    %c0_14 = arith.constant 0 : index
    %c0_15 = arith.constant 0 : index
    %18 = vector.load %arg6[%c0_14, %c0_15] : memref<1x16xf32, #tpu.memory_space<vmem>>, vector<1x16xf32>
    %19 = arith.truncf %16 : vector<8x128xf32> to vector<8x128xbf16>
    %cst_16 = arith.constant dense<0.000000e+00> : vector<8x16xf32>
    %20 = tpu.matmul %19, %17, %cst_16 {dimension_numbers = #tpu.dot_dimension_numbers<[1], [0], [0], [1], [0, 0, 1, 1], [], []>} : vector<8x128xbf16>, vector<128x16xbf16>, vector<8x16xf32> -> vector<8x16xf32>
    %21 = vector.broadcast %18 : vector<1x16xf32> to vector<8x16xf32>
    %22 = arith.addf %20, %21 : vector<8x16xf32>
    %23 = arith.negf %22 : vector<8x16xf32>
    %24 = math.exp %23 : vector<8x16xf32>
    %cst_17 = arith.constant 1.000000e+00 : f32
    %25 = vector.broadcast %cst_17 : f32 to vector<8x16xf32>
    %26 = arith.addf %25, %24 : vector<8x16xf32>
    %27 = arith.divf %25, %26 : vector<8x16xf32>
    %c0_18 = arith.constant 0 : index
    %c0_19 = arith.constant 0 : index
    %28 = vector.load %arg7[%c0_18, %c0_19] : memref<8x16xf32, #tpu.memory_space<vmem>>, vector<8x16xf32>
    tpu.vector_store %arg7[%c0_18, %c0_19], %27 {strides = array<i32>} : memref<8x16xf32, #tpu.memory_space<vmem>>, vector<8x16xf32>,
    return
  }
}

</mosaic_0001>

<bundles_post_ra>
// kernel: tpu_custom_call.1
= control target key start
LH: loop header
LB: loop body
LE: loop exit
PB: predicated region body
PF: predicated region fallthrough
CT: control target
= control target key end

     0   :  { %12 = vsyncpa [#allocation3], 0  ;;  %s697_s0 = inlined_call_operand.vmem [shape: f32[8,32], index: 0, kind: input, shape index: {}]   ;;  %s698_s1 = inlined_call_operand.hbm [shape: bf16[32,128], index: 1, kind: input, shape index: {}]   ;;  %s699_s2 = inlined_call_operand.vmem [shape: f32[1,128], index: 2, kind: input, shape index: {}]   ;;  %s700_s3 = inlined_call_operand.vmem [shape: bf16[128,128], index: 3, kind: input, shape index: {}]   ;;  %s701_s4 = inlined_call_operand.hbm [shape: f32[1,128], index: 4, kind: input, shape index: {}]   ;;  %s702_s5 = inlined_call_operand.vmem [shape: bf16[128,16], index: 5, kind: input, shape index: {}]   ;;  %s703_s6 = inlined_call_operand.vmem [shape: f32[1,16], index: 6, kind: input, shape index: {}]   ;;  %s704_s7 = inlined_call_operand.hbm [shape: f32[8,16], index: 7, kind: output, shape index: {}]  }
   0x1   :  { %13 = vsyncpa [#allocation6], 0 }
   0x2   :  { %14 = vsyncpa [#allocation4], 0  ;;  %s560_s24 = smov [#allocation2]  }
   0x3   :  { %s22_s25 = sshll.u32 %s560_s24, 4  ;;  %s23_s25 = int_to_ptr.vmem [resolvable:$true] %s22_s25 }
   0x4   :  { %s502_s26 = scalar_lea.vmem %s23_s25, 256  ;;  %p507_p1 = scmp.lt.s32.totalorder %s23_s25, %s23_s25 }
   0x5   :  { %p503_p0 = scmp.ne.s32.totalorder %s23_s25, %s502_s26  ;;  %p508_p2 = scmp.lt.s32.totalorder %s502_s26, %s502_s26 }
   0x7   :  { %p509_p3 = por %p508_p2, %p507_p1 }
   0x9   :  { %p510_p4 = pnand %p509_p3, %p503_p0 }
   0xb   :  { %513 = shalt.err (!%p510_p4)
}
   0xc   :  { %s561_s27 = smov 64   ;;  %s562_s28 = smov 4  }
   0xd   :  { %28 = dma.hbm_to_vmem [thread:$0]  %s698_s1, 256, %s23_s25, [#allocation3], %s561_s27, %s561_s27, %s562_s28  }
   0xe   :  { %s563_s8 = smov [#allocation5]  }
   0xf   :  { %s39_s9 = sshll.u32 %s563_s8, 4  ;;  %s40_s9 = int_to_ptr.vmem [resolvable:$true] %s39_s9 }
  0x10   :  { %s522_s10 = scalar_lea.vmem %s40_s9, 16  ;;  %s526_s11 = scalar_lea.vmem %s40_s9, 32 }
  0x11   :  { %p523_p5 = scmp.ne.s32.totalorder %s40_s9, %s522_s10  ;;  %p527_p6 = scmp.lt.s32.totalorder %s40_s9, %s40_s9 }
  0x12   :  { %p528_p7 = scmp.lt.s32.totalorder %s526_s11, %s522_s10 }
  0x14   :  { %p529_p8 = por %p528_p7, %p527_p6 }
  0x16   :  { %p530_p9 = pnand %p529_p8, %p523_p5 }
  0x18   :  { %533 = shalt.err (!%p530_p9)
}
  0x19   :  { %42 = dma.hbm_to_vmem [thread:$0]  %s701_s4, 16, %s40_s9, [#allocation6]  }
  0x1a   :  { %554 = dma.done.wait [#allocation3], 256  }
  0x1b   :  { %555 = vsyncadd [#allocation3], 4294967040 }
  0x1c   :  { %556 = dma.done.wait [#allocation6], 16  }
  0x1d   :  { %557 = vsyncadd [#allocation6], 4294967280  ;;  %v564_v0 = vmov 0.0   ;;  %vm565_vm0 = vmmov 0   ;;  %v472_v1 = vld [vmem:[#allocation2 + $0x8] sm:$0xff]   ;;  %v473_v2 = vld [vmem:[#allocation2] sm:$0xff]  }
  0x1e   :  { %417 = vmatprep.subr.bf16.mxu0 %v564_v0  ;;  %421 = vmatprep.mubr.msk.bf16.mxu0 %vm565_vm0, %v564_v0  ;;  %v54_v3 = vld [vmem:[%s697_s0] sm:$0xff]  ;;  %v474_v4 = vld [vmem:[%s700_s3 + $0x38] sm:$0xff]   ;;  %v475_v6 = vld [vmem:[%s700_s3 + $0x30] sm:$0xff]   ;;  %vm79_vm1 = vcmask 261120   ;;  %vm355_vm2 = vcmask 130048  }
  0x1f   :  { %425 = vmatprep.subr.bf16.mxu1 %v564_v0  ;;  %441 = vmatprep.mubr.msk.bf16.mxu1 %vm565_vm0, %v564_v0  ;;  %v60_v5 = vpack.c.bf16 %v54_v3, %v54_v3  ;;  %v476_v7 = vld [vmem:[%s700_s3 + $0x28] sm:$0xff]   ;;  %v477_v8 = vld [vmem:[%s700_s3 + $0x20] sm:$0xff]   ;;  %v478_v9 = vld [vmem:[%s700_s3 + $0x18] sm:$0xff]  }
  0x20   :  { %418 = vmatpush3.bf16.msra.mxu0 %v472_v1  ;;  %426 = vmatpush3.bf16.msra.mxu1 %v474_v4  ;;  %v479_v10 = vld [vmem:[%s700_s3 + $0x10] sm:$0xff]   ;;  %v480_v11 = vld [vmem:[%s700_s3 + $0x8] sm:$0xff]   ;;  %v481_v12 = vld [vmem:[%s700_s3] sm:$0xff]  }
  0x21   :  { %419 = vmatprep.subr.bf16.mxu0 %v564_v0  ;;  %427 = vmatprep.subr.bf16.mxu1 %v564_v0  ;;  %v482_v13 = vld [vmem:[%s702_s5 + $0x38] sm:$0xff]   ;;  %v483_v14 = vld [vmem:[%s702_s5 + $0x30] sm:$0xff]   ;;  %v484_v15 = vld [vmem:[%s702_s5 + $0x28] sm:$0xff]  }
  0x22   :  { %v485_v16 = vld [vmem:[%s702_s5 + $0x20] sm:$0xff]   ;;  %v486_v17 = vld [vmem:[%s702_s5 + $0x18] sm:$0xff]   ;;  %v487_v18 = vld [vmem:[%s702_s5 + $0x10] sm:$0xff]  }
  0x23   :  { %v373_v19 = vld [vmem:[%s699_s2] ss:$0 sm:$0xff]  ;;  %v488_v27 = vld [vmem:[%s702_s5 + $0x8] sm:$0xff]   ;;  %v377_v29 = vld [vmem:[#allocation5] ss:$0 sm:$0xff] }
  0x24   :  { %420 = vmatpush3.bf16.msra.mxu0 %v473_v2  ;;  %428 = vmatpush3.bf16.msra.mxu1 %v475_v6  ;;  %v489_v28 = vld [vmem:[%s702_s5] sm:$0xff]   ;;  %s566_s5 = smov [#allocation7]  }
  0x25   :  { %445 = vmatprep.subr.bf16.mxu0 %v564_v0  ;;  %429 = vmatprep.subr.bf16.mxu1 %v564_v0  ;;  %v386_v37 = vld [vmem:[%s703_s6] ss:$0 sm:$0xff]  ;;  %s363_s21 = sshll.u32 %s566_s5, 4  ;;  %s364_s21 = int_to_ptr.vmem [resolvable:$true] %s363_s21 }
  0x26   :  { %s534_s22 = scalar_lea.vmem %s364_s21, 128  ;;  %p539_p11 = scmp.lt.s32.totalorder %s364_s21, %s364_s21 }
  0x27   :  { %422 = vmatmul.mubr.msk.bf16.vlgmr.msra.gmra.mxu0 %vm79_vm1, %v60_v5  ;;  %p535_p10 = scmp.ne.s32.totalorder %s364_s21, %s534_s22  ;;  %p540_p12 = scmp.lt.s32.totalorder %s534_s22, %s534_s22 }
  0x28   :  { %461 = vmatprep.mubr.msk.bf16.mxu0 %vm565_vm0, %v564_v0  ;;  %430 = vmatpush3.bf16.msra.mxu1 %v476_v7 }
  0x29   :  { %431 = vmatprep.subr.bf16.mxu1 %v564_v0  ;;  %446 = vmatpush3.bf16.msra.mxu0 %v482_v13  ;;  %p541_p13 = por %p540_p12, %p539_p11 }
  0x2a   :  { %447 = vmatprep.subr.bf16.mxu0 %v564_v0 }
  0x2b   :  { %p542_p0 = pnand %p541_p13, %p535_p10 }
  0x2c   :  { %432 = vmatpush3.bf16.msra.mxu1 %v477_v8 }
  0x2d   :  { %433 = vmatprep.subr.bf16.mxu1 %v564_v0  ;;  %448 = vmatpush3.bf16.msra.mxu0 %v483_v14 }
  0x2e   :  { %449 = vmatprep.subr.bf16.mxu0 %v564_v0 }
  0x30   :  { %434 = vmatpush3.bf16.msra.mxu1 %v478_v9 }
  0x31   :  { %435 = vmatprep.subr.bf16.mxu1 %v564_v0  ;;  %450 = vmatpush3.bf16.msra.mxu0 %v484_v15 }
  0x32   :  { %451 = vmatprep.subr.bf16.mxu0 %v564_v0 }
  0x34   :  { %436 = vmatpush3.bf16.msra.mxu1 %v479_v10 }
  0x35   :  { %437 = vmatprep.subr.bf16.mxu1 %v564_v0  ;;  %452 = vmatpush3.bf16.msra.mxu0 %v485_v16 }
  0x36   :  { %453 = vmatprep.subr.bf16.mxu0 %v564_v0 }
  0x38   :  { %438 = vmatpush3.bf16.msra.mxu1 %v480_v11 }
  0x39   :  { %439 = vmatprep.subr.bf16.mxu1 %v564_v0  ;;  %454 = vmatpush3.bf16.msra.mxu0 %v486_v17 }
  0x3a   :  { %455 = vmatprep.subr.bf16.mxu0 %v564_v0 }
  0x3c   :  { %440 = vmatpush3.bf16.msra.mxu1 %v481_v12 }
  0x3d   :  { %456 = vmatpush3.bf16.msra.mxu0 %v487_v18 }
  0x3e   :  { %457 = vmatprep.subr.bf16.mxu0 %v564_v0 }
  0x41   :  { %458 = vmatpush3.bf16.msra.mxu0 %v488_v27 }
  0x42   :  { %459 = vmatprep.subr.bf16.mxu0 %v564_v0 }
  0x45   :  { %460 = vmatpush3.bf16.msra.mxu0 %v489_v28 }
  0xe7   :  { %v117_v20 = vpop.f32.mrf.mxu0 }
  0xe8   :  { %v118_v21 = vadd.f32 %v373_v19, %v117_v20 }
  0xe9   :  { %v423_v22 = vpop.f32.mrf.mxu0 }
  0xea   :  { %v123_v23 = vmax.f32 %v118_v21, 0.0 }
  0xeb   :  { %v120_v24 = vpop.f32.mrf.mxu0 }
  0xec   :  { %v141_v25 = vpack.c.bf16 %v123_v23, %v123_v23 }
  0xed   :  { %v424_v26 = vpop.f32.mrf.mxu0 }
  0xee   :  { %442 = vmatmul.mubr.bf16.vlgmr.msra.gmra.mxu1 %v141_v25 }
 0x1ae   :  { %v230_v30 = vpop.f32.mrf.mxu1 }
 0x1af   :  { %v231_v31 = vadd.f32 %v377_v29, %v230_v30 }
 0x1b0   :  { %v443_v32 = vpop.f32.mrf.mxu1 }
 0x1b1   :  { %v236_v33 = vmax.f32 %v231_v31, 0.0 }
 0x1b2   :  { %v233_v34 = vpop.f32.mrf.mxu1 }
 0x1b3   :  { %v254_v35 = vpack.c.bf16 %v236_v33, %v236_v33 }
 0x1b4   :  { %v444_v36 = vpop.f32.mrf.mxu1 }
 0x1b5   :  { %462 = vmatmul.mubr.bf16.vlgmr.msra.gmra.mxu0 %v254_v35 }
 0x275   :  { %v343_v38 = vpop.f32.mrf.mxu0 }
 0x276   :  { %v344_v39 = vadd.f32 %v386_v37, %v343_v38 }
 0x277   :  { %v463_v40 = vpop.f32.mrf.mxu0 }
 0x278   :  { %v395_v41 = vmul.f32 -1.442695, %v344_v39 }
 0x279   :  { %v346_v42 = vpop.f32.mrf.mxu0 }
 0x27a   :  { %490 = vpow2.f32 %v395_v41 }
 0x27b   :  { %v464_v43 = vpop.f32.mrf.mxu0 }
 0x287   :  { %v491_v44 = vpop.eup %490 }
 0x288   :  { %v352_v45 = vadd.f32 1.0, %v491_v44 }
 0x28a   :  { %492 = vrcp.f32 %v352_v45 }
 0x297   :  { %v493_v46 = vpop.eup %492 }
 0x298   :  { %356 = vst.msk [vmem:[#allocation7] sm:$0xff] %vm355_vm2, %v493_v46 }
 0x299   :  { %545 = shalt.err (!%p542_p0)
}
 0x29a   :  { %366 = dma.vmem_to_hbm [thread:$0]  %s364_s21, 128, %s704_s7, [#allocation4]  }
 0x29b   :  { %558 = dma.done.wait [#allocation4], 128  }
 0x29c   :  { %559 = vsyncadd [#allocation4], 4294967168 }
 0x29d   :  { %370 = vsyncpa [#allocation3], 1 }
 0x29e   :  { %371 = vsyncpa [#allocation6], 1 }
 0x29f   :  { %372 = vsyncpa [#allocation4], 1 }

</bundles_post_ra>
